<compile_context>
chip_gen: v7x
topology: tpu7x:2x2x1
jax: 0.10.0
libtpu: 0.0.40
codegen_flags: <defaults>
</compile_context>

<pallas_src>
import functools

import jax
import jax.numpy as jnp
from jax.experimental import pallas as pl
from jax.experimental.pallas import tpu as pltpu

_SUBLANE = 8  # sublane grain (second-to-last dim)


def _round_up(n, m):
    return ((n + m - 1) // m) * m


# --------------------------------------------------------------------------
# Capability probe: pipeline_mode=pl.Buffered(1) on grid-invariant blocks.
# --------------------------------------------------------------------------
@functools.cache
def _supports_single_buffering():
    """True if this JAX/Mosaic build accepts pl.Buffered(1) on pallas_call
    BlockSpecs (used to single-buffer the grid-invariant weight/bias blocks,
    halving their resident VMEM -- relevant on v7x's 64 MiB VMEM -- at zero
    perf cost since those blocks never change across grid steps)."""
    if not hasattr(pl, "Buffered"):
        return False
    vmem = pltpu.MemorySpace.VMEM

    def _probe(x_ref, w_ref, b_ref, o_ref):
        o_ref[...] = x_ref[...] * w_ref[...] + b_ref[...]

    try:
        fn = pl.pallas_call(
            _probe,
            out_shape=jax.ShapeDtypeStruct((16, 128), jnp.float32),
            grid=(2,),
            in_specs=[
                pl.BlockSpec((8, 128), lambda i: (i, 0), memory_space=vmem),
                pl.BlockSpec((8, 128), lambda i: (0, 0), memory_space=vmem,
                             pipeline_mode=pl.Buffered(1)),
                pl.BlockSpec((1, 128), lambda i: (0, 0), memory_space=vmem,
                             pipeline_mode=pl.Buffered(1)),
            ],
            out_specs=pl.BlockSpec((8, 128), lambda i: (i, 0),
                                   memory_space=vmem),
        )
        args = (jnp.ones((16, 128), jnp.float32),
                jnp.ones((8, 128), jnp.float32),
                jnp.ones((1, 128), jnp.float32))
        jax.jit(fn).lower(*args).compile()
        return True
    except Exception:  # any failure -> fall back to default double-buffering
        return False


# --------------------------------------------------------------------------
# Kernel body: the whole MLP, layers unrolled, activations stay on-chip.
# --------------------------------------------------------------------------
def _fused_mlp_kernel(*refs, num_layers):
    """refs = (x_ref, w_1, b_1, ..., w_L, b_L, o_ref)

      x_ref : (tm, D0)        f32
      w_l   : (D_{l-1}, D_l)  bf16, already transposed to (In, Out)
      b_l   : (1, D_l)        f32
      o_ref : (tm, D_L)       f32
    """
    x_ref = refs[0]
    o_ref = refs[1 + 2 * num_layers]

    h = x_ref[...].astype(jnp.float32)
    for l in range(num_layers):
        w = refs[1 + 2 * l][...]          # bf16 (In, Out)
        b = refs[2 + 2 * l][...]          # f32  (1, Out)
        # bf16 operands -> native MXU path; f32 accumulate; f32 epilogue.
        h = jnp.dot(h.astype(jnp.bfloat16), w,
                    preferred_element_type=jnp.float32) + b
        if l < num_layers - 1:
            h = jnp.maximum(h, 0.0)
    o_ref[...] = h.astype(o_ref.dtype)


# --------------------------------------------------------------------------
# One-time parameter packing (do NOT re-run per forward call).
# --------------------------------------------------------------------------
def prepare_params(params):
    """Transpose PyTorch-layout weights (out, in) -> (in, out), cast to bf16,
    and reshape biases to (1, out). Call once; pass the result to net_forward."""
    packed = []
    for w, b in params:
        w = jnp.asarray(w, jnp.float32)
        b = jnp.asarray(b, jnp.float32)
        packed.append((jnp.transpose(w).astype(jnp.bfloat16),
                       b.reshape(1, -1)))
    return packed


# --------------------------------------------------------------------------
# Forward pass.
# --------------------------------------------------------------------------
@functools.partial(jax.jit,
                   static_argnames=("batch_tile", "single_buffer_weights"))
def _net_forward_impl(x, packed, *, batch_tile, single_buffer_weights):
    B, in_dim = x.shape
    num_layers = len(packed)
    out_dim = packed[-1][0].shape[1]

    # ---- batch tiling --------------------------------------------------
    B8 = _round_up(B, _SUBLANE)
    if B8 >= 2 * _SUBLANE:
        # >= 2 grid steps so ("parallel",) can shard across v7x's two TCs,
        # but keep tiles big (default cap 512) for v5e/v6e step amortization
        # and full-height MXU LHS tiles.
        tm = min(_round_up(batch_tile, _SUBLANE),
                 _round_up(pl.cdiv(B8, 2), _SUBLANE))
    else:
        tm = B8
    B_pad = _round_up(B8, tm)
    grid = (B_pad // tm,)

    if B_pad != B:
        x = jnp.pad(x, ((0, B_pad - B), (0, 0)))

    # ---- specs ----------------------------------------------------------
    vmem = pltpu.MemorySpace.VMEM

    def const_spec(shape):
        # Grid-invariant block: never re-DMA'd; single-buffer when supported.
        if single_buffer_weights:
            return pl.BlockSpec(shape, lambda i: (0, 0), memory_space=vmem,
                                pipeline_mode=pl.Buffered(1))
        return pl.BlockSpec(shape, lambda i: (0, 0), memory_space=vmem)

    flat_inputs = [x]
    in_specs = [pl.BlockSpec((tm, in_dim), lambda i: (i, 0),
                             memory_space=vmem)]
    for w, b in packed:
        flat_inputs += [w, b]
        in_specs += [const_spec(w.shape), const_spec(b.shape)]

    out = pl.pallas_call(
        functools.partial(_fused_mlp_kernel, num_layers=num_layers),
        out_shape=jax.ShapeDtypeStruct((B_pad, out_dim), jnp.float32),
        grid=grid,
        in_specs=in_specs,
        out_specs=pl.BlockSpec((tm, out_dim), lambda i: (i, 0),
                               memory_space=vmem),
        compiler_params=pltpu.CompilerParams(
            dimension_semantics=("parallel",)),
    )(*flat_inputs)

    return out if B_pad == B else out[:B]


def net_forward(x, packed_params, *, batch_tile=512):
    """x: (B, D0) f32; packed_params: output of prepare_params()."""
    return _net_forward_impl(
        x, packed_params, batch_tile=batch_tile,
        single_buffer_weights=_supports_single_buffering())


# --------------------------------------------------------------------------
# Reference + init (for the self-test).
# --------------------------------------------------------------------------
def init_params(layers, key):
    """Deterministic init matching nn.Linear shapes: weight (out, in), bias (out,)."""
    params = []
    for i, (in_size, out_size) in enumerate(zip(layers, layers[1:])):
        kw, kb = jax.random.split(jax.random.fold_in(key, i))
        bound = 1.0 / jnp.sqrt(in_size)
        w = jax.random.uniform(kw, (out_size, in_size), jnp.float32,
                               minval=-bound, maxval=bound)
        b = jax.random.uniform(kb, (out_size,), jnp.float32,
                               minval=-bound, maxval=bound)
        params.append((w, b))
    return params


def net_forward_ref(x, params):
    """Pure-JAX reference with the same bf16-operand / f32-accumulate numerics
    as the kernel, so it can be checked with a tight tolerance."""
    L = len(params)
    for l, (w, b) in enumerate(params):
        x = jnp.dot(x.astype(jnp.bfloat16), w.T.astype(jnp.bfloat16),
                    preferred_element_type=jnp.float32) + b
        if l < L - 1:
            x = jnp.maximum(x, 0.0)
    return x


if __name__ == "__main__":
    key = jax.random.PRNGKey(0)
    Layers = [32, 64, 48, 16]   # Net(Layers): 3 Linear layers
    batch = 8

    kx, kp = jax.random.split(key)
    x = jax.random.normal(kx, (batch, Layers[0]), jnp.float32)
    params = init_params(Layers, kp)

    packed = prepare_params(params)          # one-time repack (transpose+bf16)

    out = jax.block_until_ready(net_forward(x, packed))
    ref = jax.block_until_ready(net_forward_ref(x, params))

    assert out.shape == (batch, Layers[-1])
    assert jnp.allclose(out, ref, atol=2e-3, rtol=2e-3), "mismatch vs reference"

    print("KERNEL_OK")
</pallas_src>

<mosaic_0001>
module attributes {stable_mosaic.version = 11 : i64} {
  func.func @_fused_mlp_kernel(%arg0: i32, %arg1: memref<8x32xf32, #tpu.memory_space<vmem>>, %arg2: memref<32x64xbf16, #tpu.memory_space<vmem>>, %arg3: memref<1x64xf32, #tpu.memory_space<vmem>>, %arg4: memref<64x48xbf16, #tpu.memory_space<vmem>>, %arg5: memref<1x48xf32, #tpu.memory_space<vmem>>, %arg6: memref<48x16xbf16, #tpu.memory_space<vmem>>, %arg7: memref<1x16xf32, #tpu.memory_space<vmem>>, %arg8: memref<8x16xf32, #tpu.memory_space<vmem>>) attributes {dimension_semantics = [#tpu.dimension_semantics<parallel>], iteration_bounds = array<i64: 1>, scalar_prefetch = 0 : i64, scratch_operands = 0 : i64, tpu.core_type = #tpu.core_type<tc>, window_params = [{transform_indices = @transform_0, window_bounds = array<i64: 8, 32>}, {pipeline_mode = #tpu.pipeline_mode<synchronous>, transform_indices = @transform_1, window_bounds = array<i64: 32, 64>}, {pipeline_mode = #tpu.pipeline_mode<synchronous>, transform_indices = @transform_2, window_bounds = array<i64: 1, 64>}, {pipeline_mode = #tpu.pipeline_mode<synchronous>, transform_indices = @transform_3, window_bounds = array<i64: 64, 48>}, {pipeline_mode = #tpu.pipeline_mode<synchronous>, transform_indices = @transform_4, window_bounds = array<i64: 1, 48>}, {pipeline_mode = #tpu.pipeline_mode<synchronous>, transform_indices = @transform_5, window_bounds = array<i64: 48, 16>}, {pipeline_mode = #tpu.pipeline_mode<synchronous>, transform_indices = @transform_6, window_bounds = array<i64: 1, 16>}, {transform_indices = @transform_7, window_bounds = array<i64: 8, 16>}]} {
    %c0 = arith.constant 0 : index
    %c0_0 = arith.constant 0 : index
    %0 = vector.load %arg1[%c0, %c0_0] : memref<8x32xf32, #tpu.memory_space<vmem>>, vector<8x32xf32>
    %c0_1 = arith.constant 0 : index
    %c0_2 = arith.constant 0 : index
    %1 = vector.load %arg2[%c0_1, %c0_2] : memref<32x64xbf16, #tpu.memory_space<vmem>>, vector<32x64xbf16>
    %c0_3 = arith.constant 0 : index
    %c0_4 = arith.constant 0 : index
    %2 = vector.load %arg3[%c0_3, %c0_4] : memref<1x64xf32, #tpu.memory_space<vmem>>, vector<1x64xf32>
    %3 = arith.truncf %0 : vector<8x32xf32> to vector<8x32xbf16>
    %cst = arith.constant dense<0.000000e+00> : vector<8x64xf32>
    %4 = tpu.matmul %3, %1, %cst {dimension_numbers = #tpu.dot_dimension_numbers<[1], [0], [0], [1], [0, 0, 1, 1], [], []>} : vector<8x32xbf16>, vector<32x64xbf16>, vector<8x64xf32> -> vector<8x64xf32>
    %5 = vector.broadcast %2 : vector<1x64xf32> to vector<8x64xf32>
    %6 = arith.addf %4, %5 : vector<8x64xf32>
    %cst_5 = arith.constant 0.000000e+00 : f32
    %7 = vector.broadcast %cst_5 : f32 to vector<8x64xf32>
    %8 = arith.maximumf %6, %7 : vector<8x64xf32>
    %c0_6 = arith.constant 0 : index
    %c0_7 = arith.constant 0 : index
    %9 = vector.load %arg4[%c0_6, %c0_7] : memref<64x48xbf16, #tpu.memory_space<vmem>>, vector<64x48xbf16>
    %c0_8 = arith.constant 0 : index
    %c0_9 = arith.constant 0 : index
    %10 = vector.load %arg5[%c0_8, %c0_9] : memref<1x48xf32, #tpu.memory_space<vmem>>, vector<1x48xf32>
    %11 = arith.truncf %8 : vector<8x64xf32> to vector<8x64xbf16>
    %cst_10 = arith.constant dense<0.000000e+00> : vector<8x48xf32>
    %12 = tpu.matmul %11, %9, %cst_10 {dimension_numbers = #tpu.dot_dimension_numbers<[1], [0], [0], [1], [0, 0, 1, 1], [], []>} : vector<8x64xbf16>, vector<64x48xbf16>, vector<8x48xf32> -> vector<8x48xf32>
    %13 = vector.broadcast %10 : vector<1x48xf32> to vector<8x48xf32>
    %14 = arith.addf %12, %13 : vector<8x48xf32>
    %cst_11 = arith.constant 0.000000e+00 : f32
    %15 = vector.broadcast %cst_11 : f32 to vector<8x48xf32>
    %16 = arith.maximumf %14, %15 : vector<8x48xf32>
    %c0_12 = arith.constant 0 : index
    %c0_13 = arith.constant 0 : index
    %17 = vector.load %arg6[%c0_12, %c0_13] : memref<48x16xbf16, #tpu.memory_space<vmem>>, vector<48x16xbf16>
    %c0_14 = arith.constant 0 : index
    %c0_15 = arith.constant 0 : index
    %18 = vector.load %arg7[%c0_14, %c0_15] : memref<1x16xf32, #tpu.memory_space<vmem>>, vector<1x16xf32>
    %19 = arith.truncf %16 : vector<8x48xf32> to vector<8x48xbf16>
    %cst_16 = arith.constant dense<0.000000e+00> : vector<8x16xf32>
    %20 = tpu.matmul %19, %17, %cst_16 {dimension_numbers = #tpu.dot_dimension_numbers<[1], [0], [0], [1], [0, 0, 1, 1], [], []>} : vector<8x48xbf16>, vector<48x16xbf16>, vector<8x16xf32> -> vector<8x16xf32>
    %21 = vector.broadcast %18 : vector<1x16xf32> to vector<8x16xf32>
    %22 = arith.addf %20, %21 : vector<8x16xf32>
    %c0_17 = arith.constant 0 : index
    %c0_18 = arith.constant 0 : index
    %23 = vector.load %arg8[%c0_17, %c0_18] : memref<8x16xf32, #tpu.memory_space<vmem>>, vector<8x16xf32>
    tpu.vector_store %arg8[%c0_17, %c0_18], %22 {strides = array<i32>} : memref<8x16xf32, #tpu.memory_space<vmem>>, vector<8x16xf32>,
    return
  }
  func.func @transform_0(%arg0: i32) -> (i32, i32) {
    %c0_i32 = arith.constant 0 : i32
    %c0_i32_0 = arith.constant 0 : i32
    return %arg0, %c0_i32 : i32, i32
  }
  func.func @transform_1(%arg0: i32) -> (i32, i32) {
    %c0_i32 = arith.constant 0 : i32
    %c0_i32_0 = arith.constant 0 : i32
    %c0_i32_1 = arith.constant 0 : i32
    return %c0_i32, %c0_i32_0 : i32, i32
  }
  func.func @transform_2(%arg0: i32) -> (i32, i32) {
    %c0_i32 = arith.constant 0 : i32
    %c0_i32_0 = arith.constant 0 : i32
    %c0_i32_1 = arith.constant 0 : i32
    return %c0_i32, %c0_i32_0 : i32, i32
  }
  func.func @transform_3(%arg0: i32) -> (i32, i32) {
    %c0_i32 = arith.constant 0 : i32
    %c0_i32_0 = arith.constant 0 : i32
    %c0_i32_1 = arith.constant 0 : i32
    return %c0_i32, %c0_i32_0 : i32, i32
  }
  func.func @transform_4(%arg0: i32) -> (i32, i32) {
    %c0_i32 = arith.constant 0 : i32
    %c0_i32_0 = arith.constant 0 : i32
    %c0_i32_1 = arith.constant 0 : i32
    return %c0_i32, %c0_i32_0 : i32, i32
  }
  func.func @transform_5(%arg0: i32) -> (i32, i32) {
    %c0_i32 = arith.constant 0 : i32
    %c0_i32_0 = arith.constant 0 : i32
    %c0_i32_1 = arith.constant 0 : i32
    return %c0_i32, %c0_i32_0 : i32, i32
  }
  func.func @transform_6(%arg0: i32) -> (i32, i32) {
    %c0_i32 = arith.constant 0 : i32
    %c0_i32_0 = arith.constant 0 : i32
    %c0_i32_1 = arith.constant 0 : i32
    return %c0_i32, %c0_i32_0 : i32, i32
  }
  func.func @transform_7(%arg0: i32) -> (i32, i32) {
    %c0_i32 = arith.constant 0 : i32
    %c0_i32_0 = arith.constant 0 : i32
    return %arg0, %c0_i32 : i32, i32
  }
}

</mosaic_0001>

<bundles_post_ra>
// kernel: _net_forward_impl.1
= control target key start
LH: loop header
LB: loop body
LE: loop exit
PB: predicated region body
PF: predicated region fallthrough
CT: control target
= control target key end

     0   :  { %v368_v1 = vmov 0.0   ;;  %vm369_vm0 = vmmov 0   ;;  %vm53_vm1 = vcmask 261120   ;;  %s465_s0 = inlined_call_operand.vmem [shape: f32[8,32], index: 0, kind: input, shape index: {}]   ;;  %s466_s1 = inlined_call_operand.vmem [shape: bf16[32,64], index: 1, kind: input, shape index: {}]   ;;  %s467_s2 = inlined_call_operand.vmem [shape: f32[1,64], index: 2, kind: input, shape index: {}]   ;;  %s468_s3 = inlined_call_operand.vmem [shape: bf16[64,48], index: 3, kind: input, shape index: {}]   ;;  %s469_s4 = inlined_call_operand.vmem [shape: f32[1,48], index: 4, kind: input, shape index: {}]   ;;  %s470_s5 = inlined_call_operand.vmem [shape: bf16[48,16], index: 5, kind: input, shape index: {}]   ;;  %s471_s6 = inlined_call_operand.vmem [shape: f32[1,16], index: 6, kind: input, shape index: {}]   ;;  %s472_s7 = inlined_call_operand.hbm [shape: f32[8,16], index: 7, kind: output, shape index: {}]  }
   0x1   :  { %v335_v0 = vld [vmem:[%s466_s1] sm:$0xff]   ;;  %302 = vmatprep.subr.bf16.mxu0 %v368_v1  ;;  %v336_v2 = vld [vmem:[%s466_s1 + $0x8] sm:$0xff]   ;;  %310 = vmatprep.subr.bf16.mxu1 %v368_v1 }
   0x2   :  { %303 = vmatpush3.bf16.msra.mxu0 %v335_v0  ;;  %306 = vmatprep.mubr.msk.bf16.mxu0 %vm369_vm0, %v368_v1  ;;  %v28_v3 = vld [vmem:[%s465_s0] sm:$0xff]  ;;  %v338_v5 = vld [vmem:[%s468_s3 + $0x8] sm:$0xff]  }
   0x3   :  { %304 = vmatprep.subr.bf16.mxu0 %v368_v1  ;;  %v337_v4 = vld [vmem:[%s468_s3] sm:$0xff]   ;;  %318 = vmatprep.mubr.msk.bf16.mxu1 %vm369_vm0, %v368_v1  ;;  %v34_v6 = vpack.c.bf16 %v28_v3, %v28_v3 }
   0x4   :  { %311 = vmatpush3.bf16.msra.mxu1 %v337_v4 }
   0x5   :  { %312 = vmatprep.subr.bf16.mxu1 %v368_v1 }
   0x6   :  { %305 = vmatpush3.bf16.msra.mxu0 %v336_v2 }
   0x7   :  { %322 = vmatprep.subr.bf16.mxu0 %v368_v1 }
   0x8   :  { %12 = vsyncpa [#allocation3], 0  ;;  %313 = vmatpush3.bf16.msra.mxu1 %v338_v5  ;;  %v339_v7 = vld [vmem:[%s468_s3 + $0x10] sm:$0xff]   ;;  %v340_v8 = vld [vmem:[%s468_s3 + $0x18] sm:$0xff]   ;;  %vm138_vm2 = vcmask 523264   ;;  %vm215_vm3 = vcmask 392192  }
   0x9   :  { %307 = vmatmul.mubr.msk.bf16.vlgmr.msra.gmra.mrb[0].mxu0 %vm53_vm1, %v34_v6  ;;  %314 = vmatprep.subr.bf16.mxu1 %v368_v1  ;;  %v341_v9 = vld [vmem:[%s470_s5] sm:$0xff]   ;;  %v342_v18 = vld [vmem:[%s470_s5 + $0x8] sm:$0xff]   ;;  %v343_v19 = vld [vmem:[%s470_s5 + $0x10] sm:$0xff]   ;;  %s370_s23 = smov [#allocation2]   ;;  %vm259_vm4 = vcmask 130048  }
   0xa   :  { %328 = vmatprep.mubr.msk.bf16.mxu0 %vm369_vm0, %v368_v1  ;;  %323 = vmatpush3.bf16.msra.mxu0 %v341_v9  ;;  %v275_v10 = vld [vmem:[%s467_s2] ss:$0 sm:$0xff]  ;;  %s267_s5 = sshll.u32 %s370_s23, 4  ;;  %s268_s5 = int_to_ptr.vmem [resolvable:$true] %s267_s5 }
   0xb   :  { %324 = vmatprep.subr.bf16.mxu0 %v368_v1  ;;  %v279_v20 = vld [vmem:[%s469_s4] ss:$0 sm:$0xff]  ;;  %s344_s4 = scalar_lea.vmem %s268_s5, 128  ;;  %p349_p1 = scmp.lt.s32.totalorder %s268_s5, %s268_s5 }
   0xc   :  { %315 = vmatpush3.bf16.msra.mxu1 %v339_v7  ;;  %v285_v28 = vld [vmem:[%s471_s6] ss:$0 sm:$0xff]  ;;  %p345_p0 = scmp.ne.s32.totalorder %s268_s5, %s344_s4  ;;  %p350_p2 = scmp.lt.s32.totalorder %s344_s4, %s344_s4 }
   0xd   :  { %316 = vmatprep.subr.bf16.mxu1 %v368_v1 }
   0xe   :  { %325 = vmatpush3.bf16.msra.mxu0 %v342_v18  ;;  %p351_p3 = por %p350_p2, %p349_p1 }
   0xf   :  { %326 = vmatprep.subr.bf16.mxu0 %v368_v1 }
  0x10   :  { %317 = vmatpush3.bf16.msra.mxu1 %v340_v8  ;;  %p352_p4 = pnand %p351_p3, %p345_p0 }
  0x12   :  { %327 = vmatpush3.bf16.msra.mxu0 %v343_v19 }
  0xdc   :  { %v91_v11 = vpop.f32.mrb[0].mxu0 }
  0xdd   :  { %v92_v12 = vadd.f32 %v275_v10, %v91_v11  ;;  %v308_v13 = vpop.f32.mrb[1].mxu0 }
  0xde   :  { %v94_v14 = vpop.f32.mrb[2].mxu0 }
  0xdf   :  { %v97_v15 = vmax.f32 %v92_v12, 0.0  ;;  %v309_v16 = vpop.f32.mrb[3].mxu0 }
  0xe1   :  { %v107_v17 = vpack.c.bf16 %v97_v15, %v97_v15 }
  0xe3   :  { %319 = vmatmul.mubr.msk.bf16.vlgmr.msra.gmra.mrb[0].mxu1 %vm138_vm2, %v107_v17 }
 0x1b6   :  { %v176_v21 = vpop.f32.mrb[0].mxu1 }
 0x1b7   :  { %v177_v22 = vadd.f32 %v279_v20, %v176_v21  ;;  %v320_v23 = vpop.f32.mrb[1].mxu1 }
 0x1b8   :  { %v179_v24 = vpop.f32.mrb[2].mxu1 }
 0x1b9   :  { %v182_v25 = vmax.f32 %v177_v22, 0.0  ;;  %v321_v26 = vpop.f32.mrb[3].mxu1 }
 0x1bb   :  { %v190_v27 = vpack.c.bf16 %v182_v25, %v182_v25 }
 0x1bd   :  { %329 = vmatmul.mubr.msk.bf16.vlgmr.msra.gmra.mrb[4].mxu0 %vm215_vm3, %v190_v27 }
 0x290   :  { %v253_v29 = vpop.f32.mrb[4].mxu0 }
 0x291   :  { %v254_v30 = vadd.f32 %v285_v28, %v253_v29  ;;  %v330_v31 = vpop.f32.mrb[5].mxu0 }
 0x292   :  { %v256_v32 = vpop.f32.mrb[6].mxu0 }
 0x293   :  { %v331_v33 = vpop.f32.mrb[7].mxu0  ;;  %260 = vst.msk [vmem:[#allocation2] sm:$0xff] %vm259_vm4, %v254_v30 }
 0x294   :  { %355 = shalt.err (!%p352_p4)
}
 0x295   :  { %s356_s6 = scalar_lea.hbm %s472_s7, 128 }
 0x296   :  { %p357_p5 = scmp.ne.s32.totalorder %s472_s7, %s356_s6  ;;  %p360_p6 = scmp.lt.u32.totalorder %s356_s6, %s472_s7 }
 0x298   :  { %p362_p7 = pnand %p360_p6, %p357_p5 }
 0x29a   :  { %365 = shalt.err (!%p362_p7)
}
 0x29b   :  { %270 = dma.vmem_to_hbm [thread:$0]  %s268_s5, 128, %s472_s7, [#allocation3]  }
 0x29c   :  { %366 = dma.done.wait [#allocation3], 128  }
 0x29d   :  { %367 = vsyncadd [#allocation3], 4294967168 }
 0x29e   :  { %274 = vsyncpa [#allocation3], 1 }

</bundles_post_ra>
